<compile_context>
chip_gen: v6e
topology: v6e:2x2x1
jax: 0.10.0
libtpu: 0.0.40
codegen_flags: <defaults>
</compile_context>

<pallas_src>
import functools

import jax
import jax.numpy as jnp
from jax.experimental import pallas as pl
from jax.experimental.pallas import tpu as pltpu

_INV_SQRT2 = 0.7071067811865476
_SQRT_2_OVER_PI = 0.7978845608028654


def _gelu(h, approximate):
    if approximate:
        # tanh runs on the EUP slot (free in the bundle) instead of a long VALU erf poly.
        return 0.5 * h * (1.0 + jnp.tanh(_SQRT_2_OVER_PI * (h + 0.044715 * h * h * h)))
    # exact (erf-based) GELU, matching BERT's gelu()
    return 0.5 * h * (1.0 + jax.lax.erf(h * _INV_SQRT2))


# --------------------------------------------------------------------------------------
# Kernels
# --------------------------------------------------------------------------------------
def _head_kernel(x_ref, w1_ref, b1_ref, w2_ref, b2_ref, o_ref, *, approximate):
    # x: [TB, D], w1: [D, D], b1: [1, D], w2: [D, O_pad], b2: [1, O_pad], o: [TB, O_pad]
    x = x_ref[...]

    # pre_classifier: x @ W1 + b1   (MXU, f32 accumulate)
    h = jnp.dot(x, w1_ref[...], preferred_element_type=jnp.float32)
    h = h + b1_ref[...].astype(jnp.float32)

    g = _gelu(h, approximate)

    # classifier: g @ W2 + b2   (MXU, f32 accumulate)
    out = jnp.dot(g.astype(w2_ref.dtype), w2_ref[...], preferred_element_type=jnp.float32)
    out = out + b2_ref[...].astype(jnp.float32)

    o_ref[...] = out.astype(o_ref.dtype)


def _head_kernel_ktiled(x_ref, w1_ref, b1_ref, w2_ref, b2_ref, o_ref, h_acc,
                        *, approximate):
    # Grid = (batch tiles, K tiles). x: [TB, TK], w1: [TK, D], h_acc: [TB, D] f32 scratch.
    k = pl.program_id(1)

    @pl.when(k == 0)
    def _():
        h_acc[...] = jnp.zeros_like(h_acc)

    h_acc[...] += jnp.dot(x_ref[...], w1_ref[...], preferred_element_type=jnp.float32)

    @pl.when(k == pl.num_programs(1) - 1)
    def _():
        h = h_acc[...] + b1_ref[...].astype(jnp.float32)
        g = _gelu(h, approximate)
        out = jnp.dot(g.astype(w2_ref.dtype), w2_ref[...],
                      preferred_element_type=jnp.float32)
        out = out + b2_ref[...].astype(jnp.float32)
        o_ref[...] = out.astype(o_ref.dtype)


# --------------------------------------------------------------------------------------
# Hardware-aware helpers
# --------------------------------------------------------------------------------------
def _device_kind():
    try:
        return jax.devices()[0].device_kind.lower()
    except Exception:
        return ""


def _mxu_m_align():
    kind = _device_kind()
    # v4/v5-class MXUs are 128-wide; v6e/v7x use 256-wide tiles.
    if "v5" in kind or "v4" in kind:
        return 128
    return 256


def _batch_dim_semantics():
    # v7x has 2 TensorCores per chip: shard the batch grid axis across cores.
    if "v7" in _device_kind():
        return pltpu.CORE_PARALLEL
    return pltpu.PARALLEL


def _vmem_cap_bytes():
    try:
        cap = getattr(pltpu.get_tpu_info(), "vmem_capacity_bytes", None)
        if cap:
            return int(cap * 0.85)  # ~15% headroom
    except Exception:
        pass
    return 48 << 20  # conservative fallback that fits v7x's 64 MiB VMEM


def _pick_batch_tile(B, block_b, align):
    if B <= 8:
        return 8
    if B < align:
        # small batch: single (or few) sublane-aligned tiles
        return min(pl.cdiv(B, 8) * 8, max(8, (min(block_b, B) + 7) // 8 * 8))
    tb = min(block_b, B)
    return max(align, (tb // align) * align)


# --------------------------------------------------------------------------------------
# Wrapper
# --------------------------------------------------------------------------------------
def classification_head(features, w1, b1, w2, b2, *, block_b=512, block_k=512,
                        use_bf16_matmul=False, gelu_approximate=False,
                        force_k_tiling=False):
    """features: [B, D]; w1: [D, D] (in->out); b1: [D]; w2: [D, O] (in->out); b2: [O].
       Returns [B, O] logits in features.dtype."""
    B, D = features.shape
    O = w2.shape[1]
    out_dtype = features.dtype

    if use_bf16_matmul:
        # Opt-in precision tradeoff: native bf16 MXU path with f32 accumulation.
        features = features.astype(jnp.bfloat16)
        w1 = w1.astype(jnp.bfloat16)
        w2 = w2.astype(jnp.bfloat16)

    # --- lane-dense output: pad O to a multiple of 128 ---------------------------------
    o_pad = pl.cdiv(O, 128) * 128
    if o_pad != O:
        w2 = jnp.zeros((D, o_pad), w2.dtype).at[:, :O].set(w2)
        b2 = jnp.zeros((o_pad,), b2.dtype).at[:O].set(b2)

    # --- MXU-aligned batch tile; pad batch up to the tile -------------------------------
    align = _mxu_m_align()
    tb = _pick_batch_tile(B, block_b, align)
    b_pad = pl.cdiv(B, tb) * tb

    x_isz = jnp.dtype(features.dtype).itemsize
    w_isz = jnp.dtype(w1.dtype).itemsize
    vmem_cap = _vmem_cap_bytes()

    # VMEM estimate for resident-weights path: x/out double-buffered, weights single-
    # buffered, f32 h/g intermediates materialized.
    est_resident = (2 * tb * D * x_isz + 2 * tb * o_pad * x_isz
                    + (D * D + D) * w_isz + (D * o_pad + o_pad) * w_isz
                    + 2 * tb * D * 4 + tb * o_pad * 4 + (1 << 20))

    k_tiled = force_k_tiling or (est_resident > vmem_cap)

    if k_tiled:
        d_red = pl.cdiv(D, 128) * 128
        tk = max(128, (min(block_k, d_red) // 128) * 128)
        d_red = pl.cdiv(d_red, tk) * tk        # reduction dim padded to a multiple of tk
        vmem_est = (2 * tb * tk * x_isz + 2 * tk * D * w_isz
                    + 2 * tb * o_pad * x_isz
                    + (D + D * o_pad + o_pad) * w_isz
                    + tb * D * 4               # h_acc scratch
                    + 2 * tb * D * 4 + tb * o_pad * 4 + (1 << 20))
    else:
        d_red, tk = D, D
        vmem_est = est_resident

    vmem_limit = int(min(max(vmem_est, 4 << 20), vmem_cap))

    # --- pad operands -------------------------------------------------------------------
    xp = features
    if (b_pad, d_red) != (B, D):
        xp = jnp.zeros((b_pad, d_red), features.dtype).at[:B, :D].set(features)
    w1p = w1
    if d_red != D:
        w1p = jnp.zeros((d_red, D), w1.dtype).at[:D, :].set(w1)
    b1_2d = b1.reshape(1, D)
    b2_2d = b2.reshape(1, o_pad)

    def _build_and_run(fast):
        batch_sem = _batch_dim_semantics() if fast else pltpu.PARALLEL
        resident = dict(pipeline_mode=pl.Buffered(1)) if fast else {}
        if k_tiled:
            kern = functools.partial(_head_kernel_ktiled, approximate=gelu_approximate)
            grid = (b_pad // tb, d_red // tk)
            in_specs = [
                pl.BlockSpec((tb, tk), lambda i, k: (i, k)),                 # x
                pl.BlockSpec((tk, D), lambda i, k: (k, 0)),                  # W1 (k-tiled)
                pl.BlockSpec((1, D), lambda i, k: (0, 0), **resident),       # b1
                pl.BlockSpec((D, o_pad), lambda i, k: (0, 0), **resident),   # W2
                pl.BlockSpec((1, o_pad), lambda i, k: (0, 0), **resident),   # b2
            ]
            out_specs = pl.BlockSpec((tb, o_pad), lambda i, k: (i, 0))
            scratch = [pltpu.VMEM((tb, D), jnp.float32)]
            dim_sems = (batch_sem, pltpu.ARBITRARY)
        else:
            kern = functools.partial(_head_kernel, approximate=gelu_approximate)
            grid = (b_pad // tb,)
            in_specs = [
                pl.BlockSpec((tb, D), lambda i: (i, 0)),                     # x
                pl.BlockSpec((D, D), lambda i: (0, 0), **resident),          # W1 resident
                pl.BlockSpec((1, D), lambda i: (0, 0), **resident),          # b1
                pl.BlockSpec((D, o_pad), lambda i: (0, 0), **resident),      # W2
                pl.BlockSpec((1, o_pad), lambda i: (0, 0), **resident),      # b2
            ]
            out_specs = pl.BlockSpec((tb, o_pad), lambda i: (i, 0))
            scratch = []
            dim_sems = (batch_sem,)

        fn = pl.pallas_call(
            kern,
            out_shape=jax.ShapeDtypeStruct((b_pad, o_pad), out_dtype),
            grid=grid,
            in_specs=in_specs,
            out_specs=out_specs,
            scratch_shapes=scratch,
            compiler_params=pltpu.CompilerParams(
                dimension_semantics=dim_sems,
                vmem_limit_bytes=vmem_limit,
            ),
        )
        return jax.block_until_ready(fn(xp, w1p, b1_2d, w2, b2_2d))

    try:
        out = _build_and_run(True)
    except Exception:
        # Fall back to a conservative build (plain PARALLEL, default buffering).
        out = _build_and_run(False)

    return out[:B, :O]


# --------------------------------------------------------------------------------------
# Reference + test
# --------------------------------------------------------------------------------------
def _reference(features, w1, b1, w2, b2):
    h = features @ w1 + b1
    g = 0.5 * h * (1.0 + jax.lax.erf(h / jnp.sqrt(2.0)))
    return g @ w2 + b2


def _make_params(key, D, O, dtype=jnp.float32):
    kw1, kb1, kw2, kb2 = jax.random.split(key, 4)
    bound = float(1.0 / jnp.sqrt(D))
    # PyTorch Linear stores W as [out, in]; build [out, in] then transpose to [in, out].
    W1_oi = jax.random.uniform(kw1, (D, D), minval=-bound, maxval=bound, dtype=dtype)
    b1 = jax.random.uniform(kb1, (D,), minval=-bound, maxval=bound, dtype=dtype)
    W2_oi = jax.random.uniform(kw2, (O, D), minval=-bound, maxval=bound, dtype=dtype)
    b2 = jax.random.uniform(kb2, (O,), minval=-bound, maxval=bound, dtype=dtype)
    return W1_oi.T, b1, W2_oi.T, b2


if __name__ == "__main__":
    key = jax.random.PRNGKey(0)
    k1, k2, k3, k4 = jax.random.split(key, 4)

    # ---- 1) resident-weights path (small shapes implied by the module) ----------------
    B, D, O = 16, 32, 8
    features = jax.random.normal(k1, (B, D), dtype=jnp.float32)
    w1, b1, w2, b2 = _make_params(k2, D, O)

    out = classification_head(features, w1, b1, w2, b2, block_b=8)   # grid=(2,)
    out = jax.block_until_ready(out)
    ref = _reference(features, w1, b1, w2, b2)
    assert out.shape == (B, O) and out.dtype == features.dtype
    assert jnp.allclose(out, ref, atol=1e-4, rtol=1e-4), "resident path mismatch"

    # ---- 2) K-tiled fallback path (reduction dim tiled, f32 accumulator) --------------
    B2, D2, O2 = 16, 256, 8
    features2 = jax.random.normal(k3, (B2, D2), dtype=jnp.float32)
    w1b, b1b, w2b, b2b = _make_params(k4, D2, O2)

    out2 = classification_head(features2, w1b, b1b, w2b, b2b,
                               block_b=8, block_k=128, force_k_tiling=True)  # grid=(2,2)
    out2 = jax.block_until_ready(out2)
    ref2 = _reference(features2, w1b, b1b, w2b, b2b)
    assert out2.shape == (B2, O2)
    assert jnp.allclose(out2, ref2, atol=2e-4, rtol=2e-4), "K-tiled path mismatch"

    # ---- 3) opt-in bf16 MXU path (precision tradeoff, loose tolerance) -----------------
    out3 = classification_head(features, w1, b1, w2, b2, block_b=8, use_bf16_matmul=True)
    out3 = jax.block_until_ready(out3)
    assert out3.shape == (B, O) and out3.dtype == features.dtype
    assert jnp.allclose(out3, ref, atol=2e-2, rtol=2e-2), "bf16 path mismatch"

    print("KERNEL_OK")
</pallas_src>

<mosaic_0001>
module attributes {stable_mosaic.version = 11 : i64} {
  func.func @_head_kernel(%arg0: i32, %arg1: memref<8x32xf32, #tpu.memory_space<vmem>>, %arg2: memref<32x32xf32, #tpu.memory_space<vmem>>, %arg3: memref<1x32xf32, #tpu.memory_space<vmem>>, %arg4: memref<32x128xf32, #tpu.memory_space<vmem>>, %arg5: memref<1x128xf32, #tpu.memory_space<vmem>>, %arg6: memref<8x128xf32, #tpu.memory_space<vmem>>) attributes {dimension_semantics = [#tpu.dimension_semantics<parallel>], iteration_bounds = array<i64: 2>, scalar_prefetch = 0 : i64, scratch_operands = 0 : i64, tpu.core_type = #tpu.core_type<tc>, window_params = [{transform_indices = @transform_0, window_bounds = array<i64: 8, 32>}, {pipeline_mode = #tpu.pipeline_mode<synchronous>, transform_indices = @transform_1, window_bounds = array<i64: 32, 32>}, {pipeline_mode = #tpu.pipeline_mode<synchronous>, transform_indices = @transform_2, window_bounds = array<i64: 1, 32>}, {pipeline_mode = #tpu.pipeline_mode<synchronous>, transform_indices = @transform_3, window_bounds = array<i64: 32, 128>}, {pipeline_mode = #tpu.pipeline_mode<synchronous>, transform_indices = @transform_4, window_bounds = array<i64: 1, 128>}, {transform_indices = @transform_5, window_bounds = array<i64: 8, 128>}]} {
    %c0 = arith.constant 0 : index
    %c0_0 = arith.constant 0 : index
    %0 = vector.load %arg1[%c0, %c0_0] : memref<8x32xf32, #tpu.memory_space<vmem>>, vector<8x32xf32>
    %c0_1 = arith.constant 0 : index
    %c0_2 = arith.constant 0 : index
    %1 = vector.load %arg2[%c0_1, %c0_2] : memref<32x32xf32, #tpu.memory_space<vmem>>, vector<32x32xf32>
    %cst = arith.constant dense<0.000000e+00> : vector<8x32xf32>
    %2 = tpu.matmul %0, %1, %cst {dimension_numbers = #tpu.dot_dimension_numbers<[1], [0], [0], [1], [0, 0, 1, 1], [], []>} : vector<8x32xf32>, vector<32x32xf32>, vector<8x32xf32> -> vector<8x32xf32>
    %c0_3 = arith.constant 0 : index
    %c0_4 = arith.constant 0 : index
    %3 = vector.load %arg3[%c0_3, %c0_4] : memref<1x32xf32, #tpu.memory_space<vmem>>, vector<1x32xf32>
    %4 = vector.broadcast %3 : vector<1x32xf32> to vector<8x32xf32>
    %5 = arith.addf %2, %4 : vector<8x32xf32>
    %cst_5 = arith.constant 5.000000e-01 : f32
    %6 = vector.broadcast %cst_5 : f32 to vector<8x32xf32>
    %7 = arith.mulf %6, %5 : vector<8x32xf32>
    %cst_6 = arith.constant 0.707106769 : f32
    %8 = vector.broadcast %cst_6 : f32 to vector<8x32xf32>
    %9 = arith.mulf %5, %8 : vector<8x32xf32>
    %10 = math.erf %9 : vector<8x32xf32>
    %cst_7 = arith.constant 1.000000e+00 : f32
    %11 = vector.broadcast %cst_7 : f32 to vector<8x32xf32>
    %12 = arith.addf %11, %10 : vector<8x32xf32>
    %13 = arith.mulf %7, %12 : vector<8x32xf32>
    %c0_8 = arith.constant 0 : index
    %c0_9 = arith.constant 0 : index
    %14 = vector.load %arg4[%c0_8, %c0_9] : memref<32x128xf32, #tpu.memory_space<vmem>>, vector<32x128xf32>
    %cst_10 = arith.constant dense<0.000000e+00> : vector<8x128xf32>
    %15 = tpu.matmul %13, %14, %cst_10 {dimension_numbers = #tpu.dot_dimension_numbers<[1], [0], [0], [1], [0, 0, 1, 1], [], []>} : vector<8x32xf32>, vector<32x128xf32>, vector<8x128xf32> -> vector<8x128xf32>
    %c0_11 = arith.constant 0 : index
    %c0_12 = arith.constant 0 : index
    %16 = vector.load %arg5[%c0_11, %c0_12] : memref<1x128xf32, #tpu.memory_space<vmem>>, vector<1x128xf32>
    %17 = vector.broadcast %16 : vector<1x128xf32> to vector<8x128xf32>
    %18 = arith.addf %15, %17 : vector<8x128xf32>
    %c0_13 = arith.constant 0 : index
    %c0_14 = arith.constant 0 : index
    %19 = vector.load %arg6[%c0_13, %c0_14] : memref<8x128xf32, #tpu.memory_space<vmem>>, vector<8x128xf32>
    tpu.vector_store %arg6[%c0_13, %c0_14], %18 {strides = array<i32>} : memref<8x128xf32, #tpu.memory_space<vmem>>, vector<8x128xf32>,
    return
  }
  func.func @transform_0(%arg0: i32) -> (i32, i32) {
    %c0_i32 = arith.constant 0 : i32
    %c0_i32_0 = arith.constant 0 : i32
    return %arg0, %c0_i32 : i32, i32
  }
  func.func @transform_1(%arg0: i32) -> (i32, i32) {
    %c0_i32 = arith.constant 0 : i32
    %c0_i32_0 = arith.constant 0 : i32
    %c0_i32_1 = arith.constant 0 : i32
    return %c0_i32, %c0_i32_0 : i32, i32
  }
  func.func @transform_2(%arg0: i32) -> (i32, i32) {
    %c0_i32 = arith.constant 0 : i32
    %c0_i32_0 = arith.constant 0 : i32
    %c0_i32_1 = arith.constant 0 : i32
    return %c0_i32, %c0_i32_0 : i32, i32
  }
  func.func @transform_3(%arg0: i32) -> (i32, i32) {
    %c0_i32 = arith.constant 0 : i32
    %c0_i32_0 = arith.constant 0 : i32
    %c0_i32_1 = arith.constant 0 : i32
    return %c0_i32, %c0_i32_0 : i32, i32
  }
  func.func @transform_4(%arg0: i32) -> (i32, i32) {
    %c0_i32 = arith.constant 0 : i32
    %c0_i32_0 = arith.constant 0 : i32
    %c0_i32_1 = arith.constant 0 : i32
    return %c0_i32, %c0_i32_0 : i32, i32
  }
  func.func @transform_5(%arg0: i32) -> (i32, i32) {
    %c0_i32 = arith.constant 0 : i32
    %c0_i32_0 = arith.constant 0 : i32
    return %arg0, %c0_i32 : i32, i32
  }
}

module attributes {stable_mosaic.version = 11 : i64} {
  func.func @_head_kernel(%arg0: i32, %arg1: memref<8x32xf32, #tpu.memory_space<vmem>>, %arg2: memref<32x32xf32, #tpu.memory_space<vmem>>, %arg3: memref<1x32xf32, #tpu.memory_space<vmem>>, %arg4: memref<32x128xf32, #tpu.memory_space<vmem>>, %arg5: memref<1x128xf32, #tpu.memory_space<vmem>>, %arg6: memref<8x128xf32, #tpu.memory_space<vmem>>) attributes {dimension_semantics = [#tpu.dimension_semantics<parallel>], iteration_bounds = array<i64: 2>, scalar_prefetch = 0 : i64, scratch_operands = 0 : i64, tpu.core_type = #tpu.core_type<tc>, window_params = [{transform_indices = @transform_0, window_bounds = array<i64: 8, 32>}, {pipeline_mode = #tpu.pipeline_mode<synchronous>, transform_indices = @transform_1, window_bounds = array<i64: 32, 32>}, {pipeline_mode = #tpu.pipeline_mode<synchronous>, transform_indices = @transform_2, window_bounds = array<i64: 1, 32>}, {pipeline_mode = #tpu.pipeline_mode<synchronous>, transform_indices = @transform_3, window_bounds = array<i64: 32, 128>}, {pipeline_mode = #tpu.pipeline_mode<synchronous>, transform_indices = @transform_4, window_bounds = array<i64: 1, 128>}, {transform_indices = @transform_5, window_bounds = array<i64: 8, 128>}]} {
    %c0 = arith.constant 0 : index
    %c0_0 = arith.constant 0 : index
    %0 = vector.load %arg1[%c0, %c0_0] : memref<8x32xf32, #tpu.memory_space<vmem>>, vector<8x32xf32>
    %c0_1 = arith.constant 0 : index
    %c0_2 = arith.constant 0 : index
    %1 = vector.load %arg2[%c0_1, %c0_2] : memref<32x32xf32, #tpu.memory_space<vmem>>, vector<32x32xf32>
    %cst = arith.constant dense<0.000000e+00> : vector<8x32xf32>
    %2 = tpu.matmul %0, %1, %cst {dimension_numbers = #tpu.dot_dimension_numbers<[1], [0], [0], [1], [0, 0, 1, 1], [], []>} : vector<8x32xf32>, vector<32x32xf32>, vector<8x32xf32> -> vector<8x32xf32>
    %c0_3 = arith.constant 0 : index
    %c0_4 = arith.constant 0 : index
    %3 = vector.load %arg3[%c0_3, %c0_4] : memref<1x32xf32, #tpu.memory_space<vmem>>, vector<1x32xf32>
    %4 = vector.broadcast %3 : vector<1x32xf32> to vector<8x32xf32>
    %5 = arith.addf %2, %4 : vector<8x32xf32>
    %cst_5 = arith.constant 5.000000e-01 : f32
    %6 = vector.broadcast %cst_5 : f32 to vector<8x32xf32>
    %7 = arith.mulf %6, %5 : vector<8x32xf32>
    %cst_6 = arith.constant 0.707106769 : f32
    %8 = vector.broadcast %cst_6 : f32 to vector<8x32xf32>
    %9 = arith.mulf %5, %8 : vector<8x32xf32>
    %10 = math.erf %9 : vector<8x32xf32>
    %cst_7 = arith.constant 1.000000e+00 : f32
    %11 = vector.broadcast %cst_7 : f32 to vector<8x32xf32>
    %12 = arith.addf %11, %10 : vector<8x32xf32>
    %13 = arith.mulf %7, %12 : vector<8x32xf32>
    %c0_8 = arith.constant 0 : index
    %c0_9 = arith.constant 0 : index
    %14 = vector.load %arg4[%c0_8, %c0_9] : memref<32x128xf32, #tpu.memory_space<vmem>>, vector<32x128xf32>
    %cst_10 = arith.constant dense<0.000000e+00> : vector<8x128xf32>
    %15 = tpu.matmul %13, %14, %cst_10 {dimension_numbers = #tpu.dot_dimension_numbers<[1], [0], [0], [1], [0, 0, 1, 1], [], []>} : vector<8x32xf32>, vector<32x128xf32>, vector<8x128xf32> -> vector<8x128xf32>
    %c0_11 = arith.constant 0 : index
    %c0_12 = arith.constant 0 : index
    %16 = vector.load %arg5[%c0_11, %c0_12] : memref<1x128xf32, #tpu.memory_space<vmem>>, vector<1x128xf32>
    %17 = vector.broadcast %16 : vector<1x128xf32> to vector<8x128xf32>
    %18 = arith.addf %15, %17 : vector<8x128xf32>
    %c0_13 = arith.constant 0 : index
    %c0_14 = arith.constant 0 : index
    %19 = vector.load %arg6[%c0_13, %c0_14] : memref<8x128xf32, #tpu.memory_space<vmem>>, vector<8x128xf32>
    tpu.vector_store %arg6[%c0_13, %c0_14], %18 {strides = array<i32>} : memref<8x128xf32, #tpu.memory_space<vmem>>, vector<8x128xf32>,
    return
  }
  func.func @transform_0(%arg0: i32) -> (i32, i32) {
    %c0_i32 = arith.constant 0 : i32
    %c0_i32_0 = arith.constant 0 : i32
    return %arg0, %c0_i32 : i32, i32
  }
  func.func @transform_1(%arg0: i32) -> (i32, i32) {
    %c0_i32 = arith.constant 0 : i32
    %c0_i32_0 = arith.constant 0 : i32
    %c0_i32_1 = arith.constant 0 : i32
    return %c0_i32, %c0_i32_0 : i32, i32
  }
  func.func @transform_2(%arg0: i32) -> (i32, i32) {
    %c0_i32 = arith.constant 0 : i32
    %c0_i32_0 = arith.constant 0 : i32
    %c0_i32_1 = arith.constant 0 : i32
    return %c0_i32, %c0_i32_0 : i32, i32
  }
  func.func @transform_3(%arg0: i32) -> (i32, i32) {
    %c0_i32 = arith.constant 0 : i32
    %c0_i32_0 = arith.constant 0 : i32
    %c0_i32_1 = arith.constant 0 : i32
    return %c0_i32, %c0_i32_0 : i32, i32
  }
  func.func @transform_4(%arg0: i32) -> (i32, i32) {
    %c0_i32 = arith.constant 0 : i32
    %c0_i32_0 = arith.constant 0 : i32
    %c0_i32_1 = arith.constant 0 : i32
    return %c0_i32, %c0_i32_0 : i32, i32
  }
  func.func @transform_5(%arg0: i32) -> (i32, i32) {
    %c0_i32 = arith.constant 0 : i32
    %c0_i32_0 = arith.constant 0 : i32
    return %arg0, %c0_i32 : i32, i32
  }
}

</mosaic_0001>

<bundles_post_ra>
// kernel: tpu_custom_call.1
= control target key start
LH: loop header
LB: loop body
LE: loop exit
PB: predicated region body
PF: predicated region fallthrough
CT: control target
= control target key end

     0   :  { %10 = vsyncpa [#allocation3], 0  ;;  %s1044_s0 = inlined_call_operand.hbm [shape: f32[16,32], index: 0, kind: input, shape index: {}]   ;;  %s1045_s1 = inlined_call_operand.hbm [shape: f32[32,32], index: 1, kind: input, shape index: {}]   ;;  %s1046_s2 = inlined_call_operand.vmem [shape: f32[1,32], index: 2, kind: input, shape index: {}]   ;;  %s1047_s3 = inlined_call_operand.hbm [shape: f32[32,128], index: 3, kind: input, shape index: {}]   ;;  %s1048_s4 = inlined_call_operand.vmem [shape: f32[1,128], index: 4, kind: input, shape index: {}]   ;;  %s1049_s5 = inlined_call_operand.hbm [shape: f32[16,128], index: 5, kind: output, shape index: {}]  }
   0x1   :  { %12 = vsyncpa [#allocation3 + $0x1], 0 }
   0x2   :  { %13 = vsyncpa [#allocation6], 0 }
   0x3   :  { %14 = vsyncpa [#allocation4], 0 }
   0x4   :  { %16 = vsyncpa [#allocation4 + $0x1], 0  ;;  %s861_s18 = smov 0   ;;  %s863_s19 = smov 0  }
   0x5   :  { %s865_s20 = smov 0   ;;  %s867_s21 = smov 0  }
   0x6 LB: > { %s882_s22 = sadd.s32 4294967295, %s821_s21   ;;  %s548_s23 = sadd.s32 4294967294, %s821_s21   ;;  %s821_s21 = sphi %s867_s21, %s1071_s21   ;;  %s817_s20 = sphi %s865_s20, %s1070_s20   ;;  %s813_s19 = sphi %s863_s19, %s1069_s19   ;;  %s809_s18 = sphi %s861_s18, %s1068_s18  }
   0x7   : > { %p42_p0 = scmp.ne.s32.totalorder %s813_s19, %s809_s18  ;;  %p1050_p1 = scmp.eq.s32.totalorder %s882_s22, 0 }
   0x8   : > { %p156_p3 = scmp.eq.s32.totalorder %s548_s23, 1  ;;  %p549_p5 = scmp.ge.s32.totalorder %s821_s21, 1 }
   0x9   : > { %p891_p4 = por %p1050_p1, %p42_p0  ;;  %p163_p7 = scmp.lt.s32.totalorder %s821_s21, 3 }
   0xa   : > { %p896_p6 = por %p156_p3, %p42_p0  ;;  %s823_s27 = smov [#allocation5]  }
   0xb   : > { %s1054_s24 = scalar_select %p891_p4, 1, 0 }
   0xc   : > { %s1055_s25 = scalar_select %p896_p6, 1, 0 }
   0xd   : > { %p901_p8 = pnand %p549_p5, %p163_p7  ;;  %s175_s28 = sshll.u32 %s823_s27, 4  ;;  %s176_s28 = int_to_ptr.vmem [resolvable:$true] %s175_s28 }
   0xe   : > { %s824_s30 = smov [#allocation7]   ;;  %s684_s7 = scalar_lea.vmem %s176_s28, 512 }
   0xf   : > { %s1056_s26 = scalar_select %p901_p8, 1, 0 }
  0x10   : > { %p612_p9 = pneg %p901_p8  ;;  %s191_s6 = sshll.u32 %s824_s30, 4  ;;  %s192_s6 = int_to_ptr.vmem [resolvable:$true] %s191_s6 }
  0x11   : > { %p685_p13 = scmp.ne.s32.totalorder %s176_s28, %s684_s7  ;;  %p692_p5 = scmp.lt.s32.totalorder %s176_s28, %s176_s28 }
  0x12   : > { %p910_p11 = pnand %p612_p9, %p1050_p1  ;;  %p693_p7 = scmp.lt.s32.totalorder %s684_s7, %s684_s7 }
  0x14   : > { %p675_p12 = pneg %p910_p11  ;;  %p694_p10 = por %p693_p7, %p692_p5 }
  0x16   : > { %p687_p0 = pnand %p685_p13, %p675_p12 }
  0x18   : > { %p688_p3 = pneg %p687_p0 }
  0x1a   : > { %p695_p9 = pnand %p694_p10, %p688_p3 }
  0x1c   : > { %698 = shalt.err (!%p695_p9)
}
  0x1d   : > { %s825_s8 = smov 128   ;;  %s826_s9 = smov 8  }
  0x1e   : > { %615 = dma.hbm_to_vmem [thread:$0]  (!%p910_p11), %s1045_s1, 512, %s176_s28, [#allocation6], %s825_s8, %s825_s8, %s826_s9  }
  0x1f   : > { %s710_s12 = scalar_lea.vmem %s192_s6, 512  ;;  %p718_p2 = scmp.lt.s32.totalorder %s192_s6, %s192_s6 }
  0x20   : > { %p711_p1 = scmp.ne.s32.totalorder %s192_s6, %s710_s12  ;;  %p719_p6 = scmp.lt.s32.totalorder %s710_s12, %s710_s12 }
  0x22   : > { %p713_p13 = pnand %p711_p1, %p675_p12  ;;  %p720_p5 = por %p719_p6, %p718_p2 }
  0x24   : > { %p714_p0 = pneg %p713_p13 }
  0x26   : > { %p721_p10 = pnand %p720_p5, %p714_p0 }
  0x28   : > { %724 = shalt.err (!%p721_p10)
}
  0x29   : > { %618 = dma.hbm_to_vmem [thread:$0]  (!%p910_p11), %s1047_s3, 512, %s192_s6, [#allocation6], %s825_s8, %s825_s8, %s826_s9  }
  0x2a   : > { %s933_s15 = sadd.s32 1, %s821_s21   ;;  %s29_s16 = sadd.s32 1, %s817_s20 }
  0x2b   : > { %s26_s17 = ssub.s32 %s821_s21, %s933_s15  ;;  %p36_p1 = scmp.ne.s32.totalorder %s817_s20, %s813_s19 }
  0x2c   : > { %p27_p2 = scmp.eq.s32.totalorder %s26_s17, 0  ;;  %p37_p6 = scmp.eq.s32.totalorder %s821_s21, 0 }
  0x2d   : > { %p1058_p12 = scmp.eq.s32.totalorder %s882_s22, 1  ;;  %p629_p7 = scmp.lt.s32.totalorder %s821_s21, 2 }
  0x2e   : > { %s949_s27 = scalar_select %p27_p2, %s817_s20, %s29_s16  }
  0x2f   : > { %p943_p3 = por %p1058_p12, %p36_p1  ;;  %p38_p9 = por %p37_p6, %p36_p1 }
  0x30   : > { %s208_s28 = sand.u32 1, %s817_s20   ;;  %s554_s30 = sshll.u32 %s821_s21, 7 }
  0x31   : > { %s1059_s23 = scalar_select %p943_p3, 1, 0 }
  0x32   : > { %s553_s29 = sshll.u32 %s208_s28, 3  ;;  %s956_s8 = scalar_lea.hbm %s1044_s0, %s554_s30 }
  0x33   : > { %s212_s9 = scalar_lea.vmem [#allocation2], %s553_s29  ;;  %p958_p11 = pnand %p629_p7, %p38_p9 }
  0x34   : > { %s219_s10 = sshll.u32 %s212_s9, 4  ;;  %s209_s12 = scalar_lea.sflag [#allocation3], %s208_s28  ;;  %s220_s10 = int_to_ptr.vmem [resolvable:$true] %s219_s10 }
  0x35   : > { %s725_s13 = scalar_lea.hbm %s956_s8, 128  ;;  %p727_p0 = pneg %p958_p11 }
  0x36   : > { %p726_p13 = scmp.ne.s32.totalorder %s956_s8, %s725_s13  ;;  %s730_s17 = scalar_lea.hbm %s1044_s0, 256 }
  0x37   : > { %p731_p1 = scmp.lt.s32.totalorder %s956_s8, %s1044_s0  ;;  %p732_p2 = scmp.lt.s32.totalorder %s730_s17, %s725_s13 }
  0x38   : > { %p728_p5 = pnand %p727_p0, %p726_p13 }
  0x39   : > { %p733_p6 = por %p732_p2, %p731_p1 }
  0x3a   : > { %p729_p10 = pneg %p728_p5 }
  0x3c   : > { %p734_p12 = pnand %p733_p6, %p729_p10 }
  0x3e   : > { %737 = shalt.err (!%p734_p12)
}
  0x3f   : > { %s738_s6 = scalar_lea.vmem %s220_s10, 128  ;;  %s827_s28 = smov [#allocation2]  }
  0x40   : > { %p739_p7 = scmp.ne.s32.totalorder %s220_s10, %s738_s6  ;;  %s743_s7 = sshll.u32 %s827_s28, 4  ;;  %s744_s7 = int_to_ptr.vmem [resolvable:$false] %s743_s7 }
  0x41   : > { %s745_s9 = scalar_lea.vmem %s744_s7, 256  ;;  %p746_p13 = scmp.lt.s32.totalorder %s220_s10, %s744_s7 }
  0x42   : > { %p741_p9 = pnand %p739_p7, %p727_p0  ;;  %p747_p5 = scmp.lt.s32.totalorder %s745_s9, %s738_s6 }
  0x44   : > { %p742_p3 = pneg %p741_p9  ;;  %p748_p4 = por %p747_p5, %p746_p13 }
  0x46   : > { %p749_p8 = pnand %p748_p4, %p742_p3 }
  0x48   : > { %752 = shalt.err (!%p749_p8)
}
  0x49   : > { %622 = dma.hbm_to_vmem [thread:$0]  (!%p958_p11), %s956_s8, 128, %s220_s10, %s209_s12  }
  0x4a   : > { %p1061_p10 = scmp.ne.s32.totalorder %s1056_s26, 0 }
  0x4b   : > { %s979_s13 = sand.u32 (!%p1061_p10), 1, %s813_s19   ;;  %p1062_p4 = scmp.ne.s32.totalorder (!%p1061_p10), %s1054_s24, 0 }
  0x4c   : > { %228 = sbr.rel (%p1061_p10) target bundleno = 518 (0x206), region = 40  ;;  %s556_s14 = sshll.u32 (!%p1061_p10), %s979_s13, 3 }
  0x4d   : > { %s231_s16 = scalar_lea.sflag (!%p1061_p10), [#allocation3], %s979_s13  ;;  %s234_s17 = scalar_lea.vmem (!%p1061_p10), [#allocation2], %s556_s14 }
  0x51   : > { %796 = dma.done.wait (%p1062_p4), %s231_s16, 128  }
  0x52   : > { %798 = vsyncadd (%p1062_p4), %s231_s16, 4294967168  ;;  %p1063_p8 = scmp.eq.s32.totalorder %s882_s22, 0 }
  0x54   : > { %800 = dma.done.wait (%p1063_p8), [#allocation6], 1024   ;;  %p1064_p3 = pmov %p1063_p8 }
  0x55   : > { %v828_v0 = vmov 0.0   ;;  %vm829_vm0 = vmmov 0   ;;  %v273_v1 = vld [vmem:[#allocation5 + $0x18] sm:$0xff]  ;;  %v272_v2 = vld [vmem:[#allocation5 + $0x10] sm:$0xff]  ;;  %v271_v3 = vld [vmem:[#allocation5 + $0x8] sm:$0xff]  ;;  %vm281_vm1 = vcmask 261120  }
  0x56   : > { %802 = vsyncadd (%p1064_p3), [#allocation6], 4294966272  ;;  %578 = vmatprep.subr.mxu0 %v828_v0  ;;  %586 = vmatprep.mubr.msk.f32.mxu0 %vm829_vm0, %v828_v0  ;;  %v270_v4 = vld [vmem:[#allocation5] sm:$0xff]  ;;  %v269_v5 = vld [vmem:[%s234_s17] sm:$0xff]  ;;  %s565_s11 = sshll.u32 %s882_s22, 7  ;;  %s268_s12 = scalar_lea.vmem [#allocation8], %s556_s14 }
  0x57   : > { %589 = vmatprep.subr.mxu1 %v828_v0  ;;  %597 = vmatprep.mubr.msk.f32.mxu1 %vm829_vm0, %v828_v0  ;;  %v363_v6 = vld [vmem:[#allocation7 + $0x18] sm:$0xff]  ;;  %v362_v7 = vld [vmem:[#allocation7 + $0x10] sm:$0xff]  ;;  %v361_v8 = vld [vmem:[#allocation7 + $0x8] sm:$0xff]  ;;  %s459_s30 = sshll.u32 %s268_s12, 4  ;;  %s1007_s28 = scalar_lea.hbm %s1049_s5, %s565_s11  ;;  %s460_s30 = int_to_ptr.vmem [resolvable:$true] %s459_s30 }
  0x58   : > { %579 = vmatpush3.msra.mxu0 %v273_v1  ;;  %590 = vmatpush3.msra.mxu1 %v363_v6  ;;  %v360_v9 = vld [vmem:[#allocation7] sm:$0xff]  ;;  %v560_v10 = vld [vmem:[%s1046_s2] ss:$0 sm:$0xff]  ;;  %s446_s7 = scalar_lea.sflag [#allocation4], %s979_s13  ;;  %s753_s9 = scalar_lea.vmem %s460_s30, 128 }
  0x59   : > { %580 = vmatprep.subr.mxu0 %v828_v0  ;;  %591 = vmatprep.subr.mxu1 %v828_v0  ;;  %v562_v19 = vld [vmem:[%s1048_s4] ss:$0 sm:$0xff]  ;;  %p754_p11 = scmp.ne.s32.totalorder %s460_s30, %s753_s9  ;;  %p1065_p0 = scmp.ne.s32.totalorder %s1059_s23, 0 }
  0x5a   : > { %581 = vmatpush3.msra.mxu0 %v272_v2  ;;  %592 = vmatpush3.msra.mxu1 %v362_v7  ;;  %s830_s22 = smov [#allocation8]  }
  0x5b   : > { %582 = vmatprep.subr.mxu0 %v828_v0  ;;  %593 = vmatprep.subr.mxu1 %v828_v0  ;;  %p755_p1 = pnand %p754_p11, %p1065_p0  ;;  %s757_s16 = sshll.u32 %s830_s22, 4  ;;  %s758_s16 = int_to_ptr.vmem [resolvable:$false] %s757_s16 }
  0x5c   : > { %583 = vmatpush3.msra.mxu0 %v271_v3  ;;  %594 = vmatpush3.msra.mxu1 %v361_v8  ;;  %s759_s14 = scalar_lea.vmem %s758_s16, 256  ;;  %p760_p6 = scmp.lt.s32.totalorder %s460_s30, %s758_s16 }
  0x5d   : > { %584 = vmatprep.subr.mxu0 %v828_v0  ;;  %595 = vmatprep.subr.mxu1 %v828_v0  ;;  %p756_p2 = pneg %p755_p1  ;;  %p761_p12 = scmp.lt.s32.totalorder %s759_s14, %s753_s9 }
  0x5e   : > { %585 = vmatpush3.msra.mxu0 %v270_v4  ;;  %596 = vmatpush3.msra.mxu1 %v360_v9 }
  0x5f   : > { %587 = vmatmul.mubr.msk.f32.vlgmr.msra.gmra.mxu0 %vm281_vm1, %v269_v5  ;;  %p762_p7 = por %p761_p12, %p760_p6 }
  0x61   : > { %p763_p9 = pnand %p762_p7, %p756_p2 }
 0x11f   : > { %v351_v11 = vpop.f32.mrf.mxu0 }
 0x120   : > { %v352_v12 = vadd.f32 %v560_v10, %v351_v11 }
 0x121   : > { %v588_v13 = vpop.f32.mrf.mxu0 }
 0x122   : > { %v356_v14 = vmul.f32 0.70710677, %v352_v12  ;;  %v355_v16 = vmul.f32 0.5, %v352_v12 }
 0x124   : > { %671 = verf.f32 %v356_v14 }
 0x131   : > { %v672_v15 = vpop.eup %671 }
 0x132   : > { %v358_v17 = vadd.f32 1.0, %v672_v15 }
 0x134   : > { %v359_v18 = vmul.f32 %v358_v17, %v355_v16 }
 0x136   : > { %598 = vmatmul.mubr.msk.f32.vlgmr.msra.gmra.mxu1 %vm281_vm1, %v359_v18 }
 0x1f6   : > { %v440_v20 = vpop.f32.mrf.mxu1 }
 0x1f7   : > { %v441_v21 = vadd.f32 %v562_v19, %v440_v20 }
 0x1f8   : > { %v599_v22 = vpop.f32.mrf.mxu1 }
 0x1f9   : > { %444 = vst [vmem:[%s268_s12] sm:$0xff] %v441_v21 }
 0x1fa   : > { %766 = shalt.err (!%p763_p9)
}
 0x1fb   : > { %s767_s17 = scalar_lea.hbm %s1007_s28, 128  ;;  %s771_s26 = scalar_lea.hbm %s1049_s5, 256 }
 0x1fc   : > { %p768_p13 = scmp.ne.s32.totalorder %s1007_s28, %s767_s17  ;;  %p772_p4 = scmp.lt.s32.totalorder %s1007_s28, %s1049_s5 }
 0x1fd   : > { %p773_p8 = scmp.lt.s32.totalorder %s771_s26, %s767_s17 }
 0x1fe   : > { %p769_p5 = pnand %p768_p13, %p1065_p0 }
 0x1ff   : > { %p774_p3 = por %p773_p8, %p772_p4 }
 0x200   : > { %p770_p10 = pneg %p769_p5 }
 0x202   : > { %p775_p11 = pnand %p774_p3, %p770_p10 }
 0x204   : > { %778 = shalt.err (!%p775_p11)
}
 0x205   : > { %610 = dma.vmem_to_hbm [thread:$0]  (%p1065_p0), %s460_s30, 128, %s1007_s28, %s446_s7  }
 0x206 PF: > { %s471_s11 = sand.u32 1, %s809_s18   ;;  %p1066_p1 = scmp.ne.s32.totalorder %s1055_s25, 0 }
 0x207   : > { %p1067_p2 = scmp.ge.s32.totalorder %s821_s21, 2  ;;  %s472_s12 = scalar_lea.sflag [#allocation4], %s471_s11 }
 0x209   : > { %p624_p6 = pnand %p1067_p2, %p1066_p1 }
 0x20b   : > { %p625_p12 = pneg %p624_p6 }
 0x20d   : > { %804 = dma.done.wait (%p625_p12), %s472_s12, 128  }
 0x20e   : > { %806 = vsyncadd (%p625_p12), %s472_s12, 4294967168  ;;  %p19_p7 = scmp.ge.s32.totalorder %s933_s15, 4   ;;  %s1068_s18 = smov %s813_s19 }
 0x20f   : > { %s1069_s19 = smov %s817_s20  ;;  %s1070_s20 = smov %s949_s27 }
 0x210   : > { %s1071_s21 = smov %s933_s15  ;;  %21 = sbr.rel (!%p19_p7) target bundleno = 6 (0x6), region = 93 }
 0x215   :  { %477 = vsyncpa [#allocation3], 1 }
 0x216   :  { %479 = vsyncpa [#allocation3 + $0x1], 1 }
 0x217   :  { %480 = vsyncpa [#allocation6], 1 }
 0x218   :  { %481 = vsyncpa [#allocation4], 1 }
 0x219   :  { %483 = vsyncpa [#allocation4 + $0x1], 1 }

// kernel: tpu_custom_call.1
= control target key start
LH: loop header
LB: loop body
LE: loop exit
PB: predicated region body
PF: predicated region fallthrough
CT: control target
= control target key end

     0   :  { %10 = vsyncpa [#allocation3], 0  ;;  %s1044_s0 = inlined_call_operand.hbm [shape: f32[16,32], index: 0, kind: input, shape index: {}]   ;;  %s1045_s1 = inlined_call_operand.hbm [shape: f32[32,32], index: 1, kind: input, shape index: {}]   ;;  %s1046_s2 = inlined_call_operand.vmem [shape: f32[1,32], index: 2, kind: input, shape index: {}]   ;;  %s1047_s3 = inlined_call_operand.hbm [shape: f32[32,128], index: 3, kind: input, shape index: {}]   ;;  %s1048_s4 = inlined_call_operand.vmem [shape: f32[1,128], index: 4, kind: input, shape index: {}]   ;;  %s1049_s5 = inlined_call_operand.hbm [shape: f32[16,128], index: 5, kind: output, shape index: {}]  }
   0x1   :  { %12 = vsyncpa [#allocation3 + $0x1], 0 }
   0x2   :  { %13 = vsyncpa [#allocation6], 0 }
   0x3   :  { %14 = vsyncpa [#allocation4], 0 }
   0x4   :  { %16 = vsyncpa [#allocation4 + $0x1], 0  ;;  %s861_s18 = smov 0   ;;  %s863_s19 = smov 0  }
   0x5   :  { %s865_s20 = smov 0   ;;  %s867_s21 = smov 0  }
   0x6 LB: > { %s882_s22 = sadd.s32 4294967295, %s821_s21   ;;  %s548_s23 = sadd.s32 4294967294, %s821_s21   ;;  %s821_s21 = sphi %s867_s21, %s1071_s21   ;;  %s817_s20 = sphi %s865_s20, %s1070_s20   ;;  %s813_s19 = sphi %s863_s19, %s1069_s19   ;;  %s809_s18 = sphi %s861_s18, %s1068_s18  }
   0x7   : > { %p42_p0 = scmp.ne.s32.totalorder %s813_s19, %s809_s18  ;;  %p1050_p1 = scmp.eq.s32.totalorder %s882_s22, 0 }
   0x8   : > { %p156_p3 = scmp.eq.s32.totalorder %s548_s23, 1  ;;  %p549_p5 = scmp.ge.s32.totalorder %s821_s21, 1 }
   0x9   : > { %p891_p4 = por %p1050_p1, %p42_p0  ;;  %p163_p7 = scmp.lt.s32.totalorder %s821_s21, 3 }
   0xa   : > { %p896_p6 = por %p156_p3, %p42_p0  ;;  %s823_s27 = smov [#allocation5]  }
   0xb   : > { %s1054_s24 = scalar_select %p891_p4, 1, 0 }
   0xc   : > { %s1055_s25 = scalar_select %p896_p6, 1, 0 }
   0xd   : > { %p901_p8 = pnand %p549_p5, %p163_p7  ;;  %s175_s28 = sshll.u32 %s823_s27, 4  ;;  %s176_s28 = int_to_ptr.vmem [resolvable:$true] %s175_s28 }
   0xe   : > { %s824_s30 = smov [#allocation7]   ;;  %s684_s7 = scalar_lea.vmem %s176_s28, 512 }
   0xf   : > { %s1056_s26 = scalar_select %p901_p8, 1, 0 }
  0x10   : > { %p612_p9 = pneg %p901_p8  ;;  %s191_s6 = sshll.u32 %s824_s30, 4  ;;  %s192_s6 = int_to_ptr.vmem [resolvable:$true] %s191_s6 }
  0x11   : > { %p685_p13 = scmp.ne.s32.totalorder %s176_s28, %s684_s7  ;;  %p692_p5 = scmp.lt.s32.totalorder %s176_s28, %s176_s28 }
  0x12   : > { %p910_p11 = pnand %p612_p9, %p1050_p1  ;;  %p693_p7 = scmp.lt.s32.totalorder %s684_s7, %s684_s7 }
  0x14   : > { %p675_p12 = pneg %p910_p11  ;;  %p694_p10 = por %p693_p7, %p692_p5 }
  0x16   : > { %p687_p0 = pnand %p685_p13, %p675_p12 }
  0x18   : > { %p688_p3 = pneg %p687_p0 }
  0x1a   : > { %p695_p9 = pnand %p694_p10, %p688_p3 }
  0x1c   : > { %698 = shalt.err (!%p695_p9)
}
  0x1d   : > { %s825_s8 = smov 128   ;;  %s826_s9 = smov 8  }
  0x1e   : > { %615 = dma.hbm_to_vmem [thread:$0]  (!%p910_p11), %s1045_s1, 512, %s176_s28, [#allocation6], %s825_s8, %s825_s8, %s826_s9  }
  0x1f   : > { %s710_s12 = scalar_lea.vmem %s192_s6, 512  ;;  %p718_p2 = scmp.lt.s32.totalorder %s192_s6, %s192_s6 }
  0x20   : > { %p711_p1 = scmp.ne.s32.totalorder %s192_s6, %s710_s12  ;;  %p719_p6 = scmp.lt.s32.totalorder %s710_s12, %s710_s12 }
  0x22   : > { %p713_p13 = pnand %p711_p1, %p675_p12  ;;  %p720_p5 = por %p719_p6, %p718_p2 }
  0x24   : > { %p714_p0 = pneg %p713_p13 }
  0x26   : > { %p721_p10 = pnand %p720_p5, %p714_p0 }
  0x28   : > { %724 = shalt.err (!%p721_p10)
}
  0x29   : > { %618 = dma.hbm_to_vmem [thread:$0]  (!%p910_p11), %s1047_s3, 512, %s192_s6, [#allocation6], %s825_s8, %s825_s8, %s826_s9  }
  0x2a   : > { %s933_s15 = sadd.s32 1, %s821_s21   ;;  %s29_s16 = sadd.s32 1, %s817_s20 }
  0x2b   : > { %s26_s17 = ssub.s32 %s821_s21, %s933_s15  ;;  %p36_p1 = scmp.ne.s32.totalorder %s817_s20, %s813_s19 }
  0x2c   : > { %p27_p2 = scmp.eq.s32.totalorder %s26_s17, 0  ;;  %p37_p6 = scmp.eq.s32.totalorder %s821_s21, 0 }
  0x2d   : > { %p1058_p12 = scmp.eq.s32.totalorder %s882_s22, 1  ;;  %p629_p7 = scmp.lt.s32.totalorder %s821_s21, 2 }
  0x2e   : > { %s949_s27 = scalar_select %p27_p2, %s817_s20, %s29_s16  }
  0x2f   : > { %p943_p3 = por %p1058_p12, %p36_p1  ;;  %p38_p9 = por %p37_p6, %p36_p1 }
  0x30   : > { %s208_s28 = sand.u32 1, %s817_s20   ;;  %s554_s30 = sshll.u32 %s821_s21, 7 }
  0x31   : > { %s1059_s23 = scalar_select %p943_p3, 1, 0 }
  0x32   : > { %s553_s29 = sshll.u32 %s208_s28, 3  ;;  %s956_s8 = scalar_lea.hbm %s1044_s0, %s554_s30 }
  0x33   : > { %s212_s9 = scalar_lea.vmem [#allocation2], %s553_s29  ;;  %p958_p11 = pnand %p629_p7, %p38_p9 }
  0x34   : > { %s219_s10 = sshll.u32 %s212_s9, 4  ;;  %s209_s12 = scalar_lea.sflag [#allocation3], %s208_s28  ;;  %s220_s10 = int_to_ptr.vmem [resolvable:$true] %s219_s10 }
  0x35   : > { %s725_s13 = scalar_lea.hbm %s956_s8, 128  ;;  %p727_p0 = pneg %p958_p11 }
  0x36   : > { %p726_p13 = scmp.ne.s32.totalorder %s956_s8, %s725_s13  ;;  %s730_s17 = scalar_lea.hbm %s1044_s0, 256 }
  0x37   : > { %p731_p1 = scmp.lt.s32.totalorder %s956_s8, %s1044_s0  ;;  %p732_p2 = scmp.lt.s32.totalorder %s730_s17, %s725_s13 }
  0x38   : > { %p728_p5 = pnand %p727_p0, %p726_p13 }
  0x39   : > { %p733_p6 = por %p732_p2, %p731_p1 }
  0x3a   : > { %p729_p10 = pneg %p728_p5 }
  0x3c   : > { %p734_p12 = pnand %p733_p6, %p729_p10 }
  0x3e   : > { %737 = shalt.err (!%p734_p12)
}
  0x3f   : > { %s738_s6 = scalar_lea.vmem %s220_s10, 128  ;;  %s827_s28 = smov [#allocation2]  }
  0x40   : > { %p739_p7 = scmp.ne.s32.totalorder %s220_s10, %s738_s6  ;;  %s743_s7 = sshll.u32 %s827_s28, 4  ;;  %s744_s7 = int_to_ptr.vmem [resolvable:$false] %s743_s7 }
  0x41   : > { %s745_s9 = scalar_lea.vmem %s744_s7, 256  ;;  %p746_p13 = scmp.lt.s32.totalorder %s220_s10, %s744_s7 }
  0x42   : > { %p741_p9 = pnand %p739_p7, %p727_p0  ;;  %p747_p5 = scmp.lt.s32.totalorder %s745_s9, %s738_s6 }
  0x44   : > { %p742_p3 = pneg %p741_p9  ;;  %p748_p4 = por %p747_p5, %p746_p13 }
  0x46   : > { %p749_p8 = pnand %p748_p4, %p742_p3 }
  0x48   : > { %752 = shalt.err (!%p749_p8)
}
  0x49   : > { %622 = dma.hbm_to_vmem [thread:$0]  (!%p958_p11), %s956_s8, 128, %s220_s10, %s209_s12  }
  0x4a   : > { %p1061_p10 = scmp.ne.s32.totalorder %s1056_s26, 0 }
  0x4b   : > { %s979_s13 = sand.u32 (!%p1061_p10), 1, %s813_s19   ;;  %p1062_p4 = scmp.ne.s32.totalorder (!%p1061_p10), %s1054_s24, 0 }
  0x4c   : > { %228 = sbr.rel (%p1061_p10) target bundleno = 518 (0x206), region = 40  ;;  %s556_s14 = sshll.u32 (!%p1061_p10), %s979_s13, 3 }
  0x4d   : > { %s231_s16 = scalar_lea.sflag (!%p1061_p10), [#allocation3], %s979_s13  ;;  %s234_s17 = scalar_lea.vmem (!%p1061_p10), [#allocation2], %s556_s14 }
  0x51   : > { %796 = dma.done.wait (%p1062_p4), %s231_s16, 128  }
  0x52   : > { %798 = vsyncadd (%p1062_p4), %s231_s16, 4294967168  ;;  %p1063_p8 = scmp.eq.s32.totalorder %s882_s22, 0 }
  0x54   : > { %800 = dma.done.wait (%p1063_p8), [#allocation6], 1024   ;;  %p1064_p3 = pmov %p1063_p8 }
  0x55   : > { %v828_v0 = vmov 0.0   ;;  %vm829_vm0 = vmmov 0   ;;  %v273_v1 = vld [vmem:[#allocation5 + $0x18] sm:$0xff]  ;;  %v272_v2 = vld [vmem:[#allocation5 + $0x10] sm:$0xff]  ;;  %v271_v3 = vld [vmem:[#allocation5 + $0x8] sm:$0xff]  ;;  %vm281_vm1 = vcmask 261120  }
  0x56   : > { %802 = vsyncadd (%p1064_p3), [#allocation6], 4294966272  ;;  %578 = vmatprep.subr.mxu0 %v828_v0  ;;  %586 = vmatprep.mubr.msk.f32.mxu0 %vm829_vm0, %v828_v0  ;;  %v270_v4 = vld [vmem:[#allocation5] sm:$0xff]  ;;  %v269_v5 = vld [vmem:[%s234_s17] sm:$0xff]  ;;  %s565_s11 = sshll.u32 %s882_s22, 7  ;;  %s268_s12 = scalar_lea.vmem [#allocation8], %s556_s14 }
  0x57   : > { %589 = vmatprep.subr.mxu1 %v828_v0  ;;  %597 = vmatprep.mubr.msk.f32.mxu1 %vm829_vm0, %v828_v0  ;;  %v363_v6 = vld [vmem:[#allocation7 + $0x18] sm:$0xff]  ;;  %v362_v7 = vld [vmem:[#allocation7 + $0x10] sm:$0xff]  ;;  %v361_v8 = vld [vmem:[#allocation7 + $0x8] sm:$0xff]  ;;  %s459_s30 = sshll.u32 %s268_s12, 4  ;;  %s1007_s28 = scalar_lea.hbm %s1049_s5, %s565_s11  ;;  %s460_s30 = int_to_ptr.vmem [resolvable:$true] %s459_s30 }
  0x58   : > { %579 = vmatpush3.msra.mxu0 %v273_v1  ;;  %590 = vmatpush3.msra.mxu1 %v363_v6  ;;  %v360_v9 = vld [vmem:[#allocation7] sm:$0xff]  ;;  %v560_v10 = vld [vmem:[%s1046_s2] ss:$0 sm:$0xff]  ;;  %s446_s7 = scalar_lea.sflag [#allocation4], %s979_s13  ;;  %s753_s9 = scalar_lea.vmem %s460_s30, 128 }
  0x59   : > { %580 = vmatprep.subr.mxu0 %v828_v0  ;;  %591 = vmatprep.subr.mxu1 %v828_v0  ;;  %v562_v19 = vld [vmem:[%s1048_s4] ss:$0 sm:$0xff]  ;;  %p754_p11 = scmp.ne.s32.totalorder %s460_s30, %s753_s9  ;;  %p1065_p0 = scmp.ne.s32.totalorder %s1059_s23, 0 }
  0x5a   : > { %581 = vmatpush3.msra.mxu0 %v272_v2  ;;  %592 = vmatpush3.msra.mxu1 %v362_v7  ;;  %s830_s22 = smov [#allocation8]  }
  0x5b   : > { %582 = vmatprep.subr.mxu0 %v828_v0  ;;  %593 = vmatprep.subr.mxu1 %v828_v0  ;;  %p755_p1 = pnand %p754_p11, %p1065_p0  ;;  %s757_s16 = sshll.u32 %s830_s22, 4  ;;  %s758_s16 = int_to_ptr.vmem [resolvable:$false] %s757_s16 }
  0x5c   : > { %583 = vmatpush3.msra.mxu0 %v271_v3  ;;  %594 = vmatpush3.msra.mxu1 %v361_v8  ;;  %s759_s14 = scalar_lea.vmem %s758_s16, 256  ;;  %p760_p6 = scmp.lt.s32.totalorder %s460_s30, %s758_s16 }
  0x5d   : > { %584 = vmatprep.subr.mxu0 %v828_v0  ;;  %595 = vmatprep.subr.mxu1 %v828_v0  ;;  %p756_p2 = pneg %p755_p1  ;;  %p761_p12 = scmp.lt.s32.totalorder %s759_s14, %s753_s9 }
  0x5e   : > { %585 = vmatpush3.msra.mxu0 %v270_v4  ;;  %596 = vmatpush3.msra.mxu1 %v360_v9 }
  0x5f   : > { %587 = vmatmul.mubr.msk.f32.vlgmr.msra.gmra.mxu0 %vm281_vm1, %v269_v5  ;;  %p762_p7 = por %p761_p12, %p760_p6 }
  0x61   : > { %p763_p9 = pnand %p762_p7, %p756_p2 }
 0x11f   : > { %v351_v11 = vpop.f32.mrf.mxu0 }
 0x120   : > { %v352_v12 = vadd.f32 %v560_v10, %v351_v11 }
 0x121   : > { %v588_v13 = vpop.f32.mrf.mxu0 }
 0x122   : > { %v356_v14 = vmul.f32 0.70710677, %v352_v12  ;;  %v355_v16 = vmul.f32 0.5, %v352_v12 }
 0x124   : > { %671 = verf.f32 %v356_v14 }
 0x131   : > { %v672_v15 = vpop.eup %671 }
 0x132   : > { %v358_v17 = vadd.f32 1.0, %v672_v15 }
 0x134   : > { %v359_v18 = vmul.f32 %v358_v17, %v355_v16 }
 0x136   : > { %598 = vmatmul.mubr.msk.f32.vlgmr.msra.gmra.mxu1 %vm281_vm1, %v359_v18 }
 0x1f6   : > { %v440_v20 = vpop.f32.mrf.mxu1 }
 0x1f7   : > { %v441_v21 = vadd.f32 %v562_v19, %v440_v20 }
 0x1f8   : > { %v599_v22 = vpop.f32.mrf.mxu1 }
 0x1f9   : > { %444 = vst [vmem:[%s268_s12] sm:$0xff] %v441_v21 }
 0x1fa   : > { %766 = shalt.err (!%p763_p9)
}
 0x1fb   : > { %s767_s17 = scalar_lea.hbm %s1007_s28, 128  ;;  %s771_s26 = scalar_lea.hbm %s1049_s5, 256 }
 0x1fc   : > { %p768_p13 = scmp.ne.s32.totalorder %s1007_s28, %s767_s17  ;;  %p772_p4 = scmp.lt.s32.totalorder %s1007_s28, %s1049_s5 }
 0x1fd   : > { %p773_p8 = scmp.lt.s32.totalorder %s771_s26, %s767_s17 }
 0x1fe   : > { %p769_p5 = pnand %p768_p13, %p1065_p0 }
 0x1ff   : > { %p774_p3 = por %p773_p8, %p772_p4 }
 0x200   : > { %p770_p10 = pneg %p769_p5 }
 0x202   : > { %p775_p11 = pnand %p774_p3, %p770_p10 }
 0x204   : > { %778 = shalt.err (!%p775_p11)
}
 0x205   : > { %610 = dma.vmem_to_hbm [thread:$0]  (%p1065_p0), %s460_s30, 128, %s1007_s28, %s446_s7  }
 0x206 PF: > { %s471_s11 = sand.u32 1, %s809_s18   ;;  %p1066_p1 = scmp.ne.s32.totalorder %s1055_s25, 0 }
 0x207   : > { %p1067_p2 = scmp.ge.s32.totalorder %s821_s21, 2  ;;  %s472_s12 = scalar_lea.sflag [#allocation4], %s471_s11 }
 0x209   : > { %p624_p6 = pnand %p1067_p2, %p1066_p1 }
 0x20b   : > { %p625_p12 = pneg %p624_p6 }
 0x20d   : > { %804 = dma.done.wait (%p625_p12), %s472_s12, 128  }
 0x20e   : > { %806 = vsyncadd (%p625_p12), %s472_s12, 4294967168  ;;  %p19_p7 = scmp.ge.s32.totalorder %s933_s15, 4   ;;  %s1068_s18 = smov %s813_s19 }
 0x20f   : > { %s1069_s19 = smov %s817_s20  ;;  %s1070_s20 = smov %s949_s27 }
 0x210   : > { %s1071_s21 = smov %s933_s15  ;;  %21 = sbr.rel (!%p19_p7) target bundleno = 6 (0x6), region = 93 }
 0x215   :  { %477 = vsyncpa [#allocation3], 1 }
 0x216   :  { %479 = vsyncpa [#allocation3 + $0x1], 1 }
 0x217   :  { %480 = vsyncpa [#allocation6], 1 }
 0x218   :  { %481 = vsyncpa [#allocation4], 1 }
 0x219   :  { %483 = vsyncpa [#allocation4 + $0x1], 1 }

</bundles_post_ra>
